<compile_context>
chip_gen: v7x
topology: tpu7x:2x2x1
jax: 0.10.0
libtpu: 0.0.40
codegen_flags: <defaults>
</compile_context>

<pallas_src>
import math

import jax
import jax.numpy as jnp
import numpy as np
from jax.experimental import pallas as pl
from jax.experimental.pallas import tpu as pltpu


def _fakequant_kernel(x_ref, params_ref, o_ref):
    # x tile: (TM, C_eff) in the input dtype; quant math in f32.
    x = x_ref[...].astype(jnp.float32)
    inv_s = params_ref[0:1, :]   # (1, C_eff) f32, broadcasts over rows
    s = params_ref[1:2, :]
    lo = params_ref[2:3, :]      # q_min - base
    hi = params_ref[3:4, :]      # q_max - base
    q = jnp.clip(jnp.round(x * inv_s), lo, hi)
    o_ref[...] = (q * s).astype(o_ref.dtype)


def _choose_block_rows(n_rows, n_cols, dtype_bytes, *,
                       target_rows=512,
                       vmem_io_budget=24 * 1024 * 1024,
                       min_grid_steps=8):
    """Row tile: big enough to sit on the HBM-roofline plateau (~512 rows),
    small enough to keep >= min_grid_steps grid steps (pipelining + v7x TC
    split) and a modest double-buffered VMEM footprint."""
    per_row = 4 * n_cols * dtype_bytes            # 2 input bufs + 2 output bufs
    tm = min(target_rows, max(8, vmem_io_budget // per_row))
    # Keep enough grid steps to pipeline and to shard rows across 2 TCs (v7x).
    tm = min(tm, max(8, -(-n_rows // min_grid_steps)))
    if tm >= n_rows:
        return int(n_rows)                        # full block: no alignment rule
    tm = max(16, (tm // 16) * 16)                 # sublane-aligned (f32 & bf16)
    if tm >= n_rows:
        return int(n_rows)
    return int(tm)


def quantizer_forward(hidden_states, group_scales, group_bases, *,
                      abits, act_group_size):
    """Static asymmetric group-wise fake-quantization (Quantizer.forward)."""
    saved_shape = hidden_states.shape
    C = saved_shape[-1]
    G = act_group_size if act_group_size > 0 else C
    assert C % G == 0, "act_group_size must divide the channel dimension"
    n_groups = C // G

    gs = jnp.asarray(group_scales, jnp.float32).reshape(-1)
    gb = jnp.asarray(group_bases, jnp.float32).reshape(-1)
    assert gs.shape[0] == n_groups and gb.shape[0] == n_groups

    # Per-group -> per-channel params, base folded into clip bounds.
    q_min = 0.0
    q_max = float(2 ** abits - 1)
    scale_c = jnp.repeat(gs, G)                 # (C,)
    base_c = jnp.repeat(gb, G)
    inv_scale_c = 1.0 / scale_c                 # scale==0 -> inf, like torch x/0
    lo_c = q_min - base_c
    hi_c = q_max - base_c

    x2d = hidden_states.reshape(-1, C)
    M = x2d.shape[0]
    dtype_bytes = jnp.dtype(hidden_states.dtype).itemsize

    # Lane-dense folding: if C isn't a multiple of 128 lanes, fold k rows so
    # the last dim is k*C (multiple of 128) -> unmasked full-lane stores.
    fold = 1
    if C % 128 != 0:
        k = 128 // math.gcd(C, 128)
        if M % k == 0:
            fold = k
    C_eff = C * fold
    M_eff = M // fold
    if fold > 1:
        x2d = x2d.reshape(M_eff, C_eff)         # contiguous reshape: free
        scale_c = jnp.tile(scale_c, fold)
        inv_scale_c = jnp.tile(inv_scale_c, fold)
        lo_c = jnp.tile(lo_c, fold)
        hi_c = jnp.tile(hi_c, fold)

    # One packed (8, C_eff) param slab (rows 4..7 are replicas / padding).
    params = jnp.stack([inv_scale_c, scale_c, lo_c, hi_c,
                        inv_scale_c, scale_c, lo_c, hi_c], axis=0)

    tm = _choose_block_rows(M_eff, C_eff, dtype_bytes)
    grid = (pl.cdiv(M_eff, tm),)                # partial tail block is masked

    # VMEM: 2+2 double-buffered I/O tiles + resident param slab + headroom.
    vmem_need = 4 * tm * C_eff * dtype_bytes + 2 * 8 * C_eff * 4 + (2 << 20)
    vmem_limit = int(min(max(vmem_need, 16 * 1024 * 1024), 48 * 1024 * 1024))

    out2d = pl.pallas_call(
        _fakequant_kernel,
        out_shape=jax.ShapeDtypeStruct((M_eff, C_eff), hidden_states.dtype),
        grid_spec=pltpu.PrefetchScalarGridSpec(
            num_scalar_prefetch=0,
            grid=grid,
            in_specs=[
                # Streaming row tile of the activations.
                pl.BlockSpec((tm, C_eff), lambda i: (i, 0)),
                # Packed per-channel params: constant index_map keeps the slab
                # resident in VMEM (fetched once, never re-DMA'd).
                pl.BlockSpec((8, C_eff), lambda i: (0, 0)),
            ],
            out_specs=pl.BlockSpec((tm, C_eff), lambda i: (i, 0)),
        ),
        # input_output_aliases={0: 0} would additionally let XLA reuse the
        # activation buffer, but only helps when the caller donates it;
        # otherwise XLA inserts a defensive copy, so it is left off here.
        compiler_params=pltpu.CompilerParams(
            dimension_semantics=("parallel",),   # v7x: shard rows across 2 TCs
            vmem_limit_bytes=vmem_limit,
        ),
    )(x2d, params)

    return out2d.reshape(saved_shape)


def quantizer_reference(hidden_states, group_scales, group_bases, *,
                        abits, act_group_size):
    """Pure-JAX port of the PyTorch forward, for correctness checking."""
    saved_shape = hidden_states.shape
    C = saved_shape[-1]
    G = act_group_size if act_group_size > 0 else C
    x = hidden_states.reshape(-1, G).astype(jnp.float32)
    s = jnp.asarray(group_scales, jnp.float32).reshape(-1)
    b = jnp.asarray(group_bases, jnp.float32).reshape(-1)
    reps = x.shape[0] // s.shape[0]
    s_full = jnp.tile(s, reps)[:, None]
    b_full = jnp.tile(b, reps)[:, None]
    q_min, q_max = 0.0, float(2 ** abits - 1)
    q = jnp.clip(jnp.round(x / s_full) + b_full, q_min, q_max)
    out = (q - b_full) * s_full
    return out.reshape(saved_shape).astype(hidden_states.dtype)


# TODO(synk): the dynamic path (args.static == False / scales is None) calls an
# arbitrary Python callback `self.act_quant`; that dispatch stays in host code
# and is not part of this kernel.

if __name__ == "__main__":
    key = jax.random.PRNGKey(0)
    B, N, C = 2, 8, 32          # small demo shapes: batch=2, seq=8, hidden=32
    G = 8                       # act_group_size
    abits = 8

    k1, k2, k3 = jax.random.split(key, 3)
    x = jax.random.normal(k1, (B, N, C), dtype=jnp.float32)
    group_scales = jax.random.uniform(k2, (C // G,), jnp.float32, 0.01, 0.05)
    group_bases = jnp.round(
        jax.random.uniform(k3, (C // G,), jnp.float32, 64.0, 192.0))

    out = quantizer_forward(x, group_scales, group_bases,
                            abits=abits, act_group_size=G)
    out = jax.block_until_ready(out)

    ref = quantizer_reference(x, group_scales, group_bases,
                              abits=abits, act_group_size=G)
    np.testing.assert_allclose(np.asarray(out), np.asarray(ref),
                               rtol=1e-5, atol=1e-5)
    print("KERNEL_OK")
</pallas_src>

<mosaic_0001>
module attributes {stable_mosaic.version = 11 : i64} {
  func.func @_fakequant_kernel(%arg0: i32, %arg1: memref<4x128xf32, #tpu.memory_space<vmem>>, %arg2: memref<8x128xf32, #tpu.memory_space<vmem>>, %arg3: memref<4x128xf32, #tpu.memory_space<vmem>>) attributes {dimension_semantics = [#tpu.dimension_semantics<parallel>], iteration_bounds = array<i64: 1>, scalar_prefetch = 0 : i64, scratch_operands = 0 : i64, tpu.core_type = #tpu.core_type<tc>, window_params = [{transform_indices = @transform_0, window_bounds = array<i64: 4, 128>}, {pipeline_mode = #tpu.pipeline_mode<synchronous>, transform_indices = @transform_1, window_bounds = array<i64: 8, 128>}, {transform_indices = @transform_2, window_bounds = array<i64: 4, 128>}]} {
    %c0 = arith.constant 0 : index
    %c0_0 = arith.constant 0 : index
    %0 = vector.load %arg1[%c0, %c0_0] : memref<4x128xf32, #tpu.memory_space<vmem>>, vector<4x128xf32>
    %c0_1 = arith.constant 0 : index
    %c0_2 = arith.constant 0 : index
    %1 = vector.load %arg2[%c0_1, %c0_2] : memref<8x128xf32, #tpu.memory_space<vmem>>, vector<1x128xf32>
    %c1 = arith.constant 1 : index
    %c0_3 = arith.constant 0 : index
    %2 = vector.load %arg2[%c1, %c0_3] : memref<8x128xf32, #tpu.memory_space<vmem>>, vector<1x128xf32>
    %c2 = arith.constant 2 : index
    %c0_4 = arith.constant 0 : index
    %3 = vector.load %arg2[%c2, %c0_4] : memref<8x128xf32, #tpu.memory_space<vmem>>, vector<1x128xf32>
    %c3 = arith.constant 3 : index
    %c0_5 = arith.constant 0 : index
    %4 = vector.load %arg2[%c3, %c0_5] : memref<8x128xf32, #tpu.memory_space<vmem>>, vector<1x128xf32>
    %5 = vector.broadcast %1 : vector<1x128xf32> to vector<4x128xf32>
    %6 = arith.mulf %0, %5 : vector<4x128xf32>
    %7 = math.roundeven %6 : vector<4x128xf32>
    %8 = vector.broadcast %3 : vector<1x128xf32> to vector<4x128xf32>
    %9 = arith.maximumf %8, %7 : vector<4x128xf32>
    %10 = vector.broadcast %4 : vector<1x128xf32> to vector<4x128xf32>
    %11 = arith.minimumf %10, %9 : vector<4x128xf32>
    %12 = vector.broadcast %2 : vector<1x128xf32> to vector<4x128xf32>
    %13 = arith.mulf %11, %12 : vector<4x128xf32>
    %c0_6 = arith.constant 0 : index
    %c0_7 = arith.constant 0 : index
    %14 = vector.load %arg3[%c0_6, %c0_7] : memref<4x128xf32, #tpu.memory_space<vmem>>, vector<4x128xf32>
    tpu.vector_store %arg3[%c0_6, %c0_7], %13 {strides = array<i32>} : memref<4x128xf32, #tpu.memory_space<vmem>>, vector<4x128xf32>,
    return
  }
  func.func @transform_0(%arg0: i32) -> (i32, i32) {
    %c0_i32 = arith.constant 0 : i32
    %c0_i32_0 = arith.constant 0 : i32
    return %arg0, %c0_i32 : i32, i32
  }
  func.func @transform_1(%arg0: i32) -> (i32, i32) {
    %c0_i32 = arith.constant 0 : i32
    %c0_i32_0 = arith.constant 0 : i32
    %c0_i32_1 = arith.constant 0 : i32
    return %c0_i32, %c0_i32_0 : i32, i32
  }
  func.func @transform_2(%arg0: i32) -> (i32, i32) {
    %c0_i32 = arith.constant 0 : i32
    %c0_i32_0 = arith.constant 0 : i32
    return %arg0, %c0_i32 : i32, i32
  }
}

</mosaic_0001>

<bundles_post_ra>
// kernel: tpu_custom_call.1
= control target key start
LH: loop header
LB: loop body
LE: loop exit
PB: predicated region body
PF: predicated region fallthrough
CT: control target
= control target key end

     0   :  { %7 = vsyncpa [#allocation3], 0  ;;  %s213_s0 = inlined_call_operand.hbm [shape: f32[4,128], index: 0, kind: input, shape index: {}]   ;;  %s214_s1 = inlined_call_operand.hbm [shape: f32[8,128], index: 1, kind: input, shape index: {}]   ;;  %s215_s2 = inlined_call_operand.hbm [shape: f32[4,128], index: 2, kind: output, shape index: {}]  }
   0x1   :  { %8 = vsyncpa [#allocation6], 0 }
   0x2   :  { %9 = vsyncpa [#allocation4], 0  ;;  %s159_s9 = smov [#allocation2]   ;;  %s160_s11 = smov [#allocation5]  }
   0x3   :  { %s16_s10 = sshll.u32 %s159_s9, 4  ;;  %s26_s12 = sshll.u32 %s160_s11, 4  ;;  %s17_s10 = int_to_ptr.vmem [resolvable:$true] %s16_s10  ;;  %s27_s12 = int_to_ptr.vmem [resolvable:$true] %s26_s12 }
   0x4   :  { %s87_s15 = scalar_lea.hbm %s213_s0, 64 }
   0x5   :  { %p88_p0 = scmp.ne.s32.totalorder %s213_s0, %s87_s15  ;;  %p91_p1 = scmp.lt.u32.totalorder %s87_s15, %s213_s0 }
   0x7   :  { %p93_p2 = pnand %p91_p1, %p88_p0 }
   0x9   :  { %96 = shalt.err (!%p93_p2)
}
   0xa   :  { %s97_s20 = scalar_lea.vmem %s17_s10, 64  ;;  %p102_p4 = scmp.lt.s32.totalorder %s17_s10, %s17_s10 }
   0xb   :  { %p98_p3 = scmp.ne.s32.totalorder %s17_s10, %s97_s20  ;;  %p103_p5 = scmp.lt.s32.totalorder %s97_s20, %s97_s20 }
   0xd   :  { %p104_p6 = por %p103_p5, %p102_p4 }
   0xf   :  { %p105_p7 = pnand %p104_p6, %p98_p3 }
  0x11   :  { %108 = shalt.err (!%p105_p7)
}
  0x12   :  { %19 = dma.hbm_to_vmem [thread:$0]  %s213_s0, 64, %s17_s10, [#allocation3]  }
  0x13   :  { %s109_s25 = scalar_lea.hbm %s214_s1, 128 }
  0x14   :  { %p110_p8 = scmp.ne.s32.totalorder %s214_s1, %s109_s25  ;;  %p113_p9 = scmp.lt.u32.totalorder %s109_s25, %s214_s1 }
  0x16   :  { %p115_p10 = pnand %p113_p9, %p110_p8 }
  0x18   :  { %118 = shalt.err (!%p115_p10)
}
  0x19   :  { %s119_s30 = scalar_lea.vmem %s27_s12, 128  ;;  %p124_p12 = scmp.lt.s32.totalorder %s27_s12, %s27_s12 }
  0x1a   :  { %p120_p11 = scmp.ne.s32.totalorder %s27_s12, %s119_s30  ;;  %p125_p13 = scmp.lt.s32.totalorder %s119_s30, %s119_s30 }
  0x1c   :  { %p126_p0 = por %p125_p13, %p124_p12 }
  0x1e   :  { %p127_p1 = pnand %p126_p0, %p120_p11 }
  0x20   :  { %130 = shalt.err (!%p127_p1)
}
  0x21   :  { %29 = dma.hbm_to_vmem [thread:$0]  %s214_s1, 128, %s27_s12, [#allocation6]  }
  0x22   :  { %153 = dma.done.wait [#allocation3], 64  }
  0x23   :  { %154 = vsyncadd [#allocation3], 4294967232 }
  0x24   :  { %155 = dma.done.wait [#allocation6], 128  }
  0x25   :  { %156 = vsyncadd [#allocation6], 4294967168  ;;  %v36_v0 = vld [vmem:[#allocation2] sm:$0xf]  ;;  %v79_v1 = vld [vmem:[#allocation5] ss:$0 sm:$0xff] }
  0x26   :  { %v45_v2 = vmul.f32 %v79_v1, %v36_v0  ;;  %v80_v3 = vld [vmem:[#allocation5 + $0x2] ss:$0 sm:$0xff]  ;;  %v81_v5 = vld [vmem:[#allocation5 + $0x3] ss:$0 sm:$0xff]  ;;  %v82_v7 = vld [vmem:[#allocation5 + $0x1] ss:$0 sm:$0xff] }
  0x27   :  { %s161_s4 = smov [#allocation7]  }
  0x28   :  { %v83_v4 = vround.rtne.f32 %v45_v2  ;;  %s69_s5 = sshll.u32 %s161_s4, 4  ;;  %s70_s5 = int_to_ptr.vmem [resolvable:$true] %s69_s5 }
  0x29   :  { %s131_s6 = scalar_lea.vmem %s70_s5, 64  ;;  %p136_p3 = scmp.lt.s32.totalorder %s70_s5, %s70_s5 }
  0x2a   :  { %v51_v6 = vmax.f32 %v80_v3, %v83_v4  ;;  %p132_p2 = scmp.ne.s32.totalorder %s70_s5, %s131_s6  ;;  %p137_p4 = scmp.lt.s32.totalorder %s131_s6, %s131_s6 }
  0x2c   :  { %v56_v8 = vmin.f32 %v81_v5, %v51_v6  ;;  %p138_p5 = por %p137_p4, %p136_p3 }
  0x2e   :  { %v61_v9 = vmul.f32 %v82_v7, %v56_v8  ;;  %p139_p6 = pnand %p138_p5, %p132_p2 }
  0x30   :  { %62 = vst [vmem:[#allocation7] sm:$0xf] %v61_v9 }
  0x31   :  { %142 = shalt.err (!%p139_p6)
}
  0x32   :  { %s143_s8 = scalar_lea.hbm %s215_s2, 64 }
  0x33   :  { %p144_p7 = scmp.ne.s32.totalorder %s215_s2, %s143_s8  ;;  %p147_p8 = scmp.lt.u32.totalorder %s143_s8, %s215_s2 }
  0x35   :  { %p149_p9 = pnand %p147_p8, %p144_p7 }
  0x37   :  { %152 = shalt.err (!%p149_p9)
}
  0x38   :  { %72 = dma.vmem_to_hbm [thread:$0]  %s70_s5, 64, %s215_s2, [#allocation4]  }
  0x39   :  { %157 = dma.done.wait [#allocation4], 64  }
  0x3a   :  { %158 = vsyncadd [#allocation4], 4294967232 }
  0x3b   :  { %76 = vsyncpa [#allocation3], 1 }
  0x3c   :  { %77 = vsyncpa [#allocation6], 1 }
  0x3d   :  { %78 = vsyncpa [#allocation4], 1 }

</bundles_post_ra>
